<compile_context>
chip_gen: v7x
topology: tpu7x:2x2x1
jax: 0.10.0
libtpu: 0.0.40
codegen_flags: <defaults>
</compile_context>

<pallas_src>
import jax
import jax.numpy as jnp
from jax.experimental import pallas as pl
from jax.experimental.pallas import tpu as pltpu


def policy_net_kernel(x_ref, w1_ref, b1_ref, w2_ref, b2_ref, o_ref):
    x = x_ref[...]                                                # [S, TB]  (batch on lanes)
    # fc1 + ReLU : h = W1 @ x + b1  (MXU matmul, f32 accumulation)
    h = jnp.dot(w1_ref[...], x, preferred_element_type=jnp.float32)   # [H, TB]
    h = jnp.maximum(h + b1_ref[...], 0.0)
    # fc2 : logits = W2 @ h + b2
    logits = jnp.dot(w2_ref[...], h,
                     preferred_element_type=jnp.float32) + b2_ref[...]  # [A, TB]
    # numerically stable softmax over the action (sublane) axis
    m = jnp.max(logits, axis=0, keepdims=True)                    # [1, TB] sublane reduce (XLU)
    e = jnp.exp(logits - m)                                       # EUP
    s = jnp.sum(e, axis=0, keepdims=True)                         # [1, TB]
    probs = e * pl.reciprocal(s, approx=True)                     # EUP reciprocal, VPU mul
    o_ref[...] = probs.astype(o_ref.dtype)                        # lane-dense [A, TB] store


def policy_net_forward(x, w1, b1, w2, b2, *, block_b=8192):
    """x: [B, S]; w1: [H, S]; b1: [H]; w2: [A, H]; b2: [A] -> probs [B, A].

    Weights/biases use torch nn.Linear's native [out, in] / [out] shapes.
    """
    B, S = x.shape
    H, S2 = w1.shape
    A, H2 = w2.shape
    assert S2 == S and H2 == H

    # Batch lives on the lane axis -> the batch tile must be a multiple of 128.
    block_b = max(128, (block_b // 128) * 128)
    tb = min(block_b, pl.cdiv(B, 128) * 128)
    b_pad = pl.cdiv(B, tb) * tb

    # Feature-major layout: [S, B] in, [A, B] out (lane-dense DMA + store).
    xt = x.T
    if b_pad != B:
        # Padded columns are zeros; softmax keeps them finite and they are
        # sliced off below, so they never contaminate real rows.
        xt = jnp.pad(xt, ((0, 0), (0, b_pad - B)))

    b1c = b1.reshape(H, 1)   # biases must be 2-D inside the kernel
    b2c = b2.reshape(A, 1)

    out_t = pl.pallas_call(
        policy_net_kernel,
        out_shape=jax.ShapeDtypeStruct((A, b_pad), x.dtype),
        grid_spec=pltpu.PrefetchScalarGridSpec(
            num_scalar_prefetch=0,
            grid=(b_pad // tb,),
            in_specs=[
                pl.BlockSpec((S, tb), lambda i: (0, i)),   # x^T: tiled over batch lanes
                pl.BlockSpec((H, S), lambda i: (0, 0)),    # W1: resident
                pl.BlockSpec((H, 1), lambda i: (0, 0)),    # b1: resident
                pl.BlockSpec((A, H), lambda i: (0, 0)),    # W2: resident
                pl.BlockSpec((A, 1), lambda i: (0, 0)),    # b2: resident
            ],
            out_specs=pl.BlockSpec((A, tb), lambda i: (0, i)),
        ),
        compiler_params=pltpu.CompilerParams(
            dimension_semantics=("parallel",),             # megacore split over batch tiles
        ),
    )(xt, w1, b1c, w2, b2c)

    # Tiny [A, B] -> [B, A] transpose back to the torch-facing layout.
    return out_t[:, :B].T


def init_params(key, state_dim, hidden_dim, action_dim, dtype=jnp.float32):
    # Deterministic init mimicking nn.Linear's default U(-1/sqrt(fan_in), +1/sqrt(fan_in)),
    # with torch's native [out, in] weight shapes.
    k1, k2, k3, k4 = jax.random.split(key, 4)
    bound1 = 1.0 / jnp.sqrt(state_dim)
    bound2 = 1.0 / jnp.sqrt(hidden_dim)
    w1 = jax.random.uniform(k1, (hidden_dim, state_dim), dtype, -bound1, bound1)
    b1 = jax.random.uniform(k2, (hidden_dim,), dtype, -bound1, bound1)
    w2 = jax.random.uniform(k3, (action_dim, hidden_dim), dtype, -bound2, bound2)
    b2 = jax.random.uniform(k4, (action_dim,), dtype, -bound2, bound2)
    return w1, b1, w2, b2


if __name__ == "__main__":
    batch, state_dim, hidden_dim, action_dim = 8, 16, 32, 4

    key = jax.random.PRNGKey(0)
    kx, kp = jax.random.split(key)
    x = jax.random.normal(kx, (batch, state_dim), jnp.float32)
    w1, b1, w2, b2 = init_params(kp, state_dim, hidden_dim, action_dim)

    out = policy_net_forward(x, w1, b1, w2, b2)
    out = jax.block_until_ready(out)

    # Pure-JAX reference check (torch: relu(x @ W1^T + b1) @ W2^T + b2 -> softmax).
    ref = jax.nn.softmax(jnp.maximum(x @ w1.T + b1, 0.0) @ w2.T + b2, axis=-1)
    assert out.shape == (batch, action_dim)
    # Tolerance accounts for the approximate EUP reciprocal in the softmax.
    assert jnp.allclose(out, ref, atol=5e-3, rtol=5e-3)
    assert jnp.allclose(jnp.sum(out, axis=-1), 1.0, atol=5e-3)

    print("KERNEL_OK")
</pallas_src>

<mosaic_0001>
module attributes {stable_mosaic.version = 11 : i64} {
  func.func @policy_net_kernel(%arg0: i32, %arg1: memref<16x128xf32, #tpu.memory_space<vmem>>, %arg2: memref<32x16xf32, #tpu.memory_space<vmem>>, %arg3: memref<32x1xf32, #tpu.memory_space<vmem>>, %arg4: memref<4x32xf32, #tpu.memory_space<vmem>>, %arg5: memref<4x1xf32, #tpu.memory_space<vmem>>, %arg6: memref<4x128xf32, #tpu.memory_space<vmem>>) attributes {dimension_semantics = [#tpu.dimension_semantics<parallel>], iteration_bounds = array<i64: 1>, scalar_prefetch = 0 : i64, scratch_operands = 0 : i64, tpu.core_type = #tpu.core_type<tc>, window_params = [{transform_indices = @transform_0, window_bounds = array<i64: 16, 128>}, {pipeline_mode = #tpu.pipeline_mode<synchronous>, transform_indices = @transform_1, window_bounds = array<i64: 32, 16>}, {pipeline_mode = #tpu.pipeline_mode<synchronous>, transform_indices = @transform_2, window_bounds = array<i64: 32, 1>}, {pipeline_mode = #tpu.pipeline_mode<synchronous>, transform_indices = @transform_3, window_bounds = array<i64: 4, 32>}, {pipeline_mode = #tpu.pipeline_mode<synchronous>, transform_indices = @transform_4, window_bounds = array<i64: 4, 1>}, {transform_indices = @transform_5, window_bounds = array<i64: 4, 128>}]} {
    %c0 = arith.constant 0 : index
    %c0_0 = arith.constant 0 : index
    %0 = vector.load %arg1[%c0, %c0_0] : memref<16x128xf32, #tpu.memory_space<vmem>>, vector<16x128xf32>
    %c0_1 = arith.constant 0 : index
    %c0_2 = arith.constant 0 : index
    %1 = vector.load %arg2[%c0_1, %c0_2] : memref<32x16xf32, #tpu.memory_space<vmem>>, vector<32x16xf32>
    %cst = arith.constant dense<0.000000e+00> : vector<32x128xf32>
    %2 = tpu.matmul %1, %0, %cst {dimension_numbers = #tpu.dot_dimension_numbers<[1], [0], [0], [1], [0, 0, 1, 1], [], []>} : vector<32x16xf32>, vector<16x128xf32>, vector<32x128xf32> -> vector<32x128xf32>
    %c0_3 = arith.constant 0 : index
    %c0_4 = arith.constant 0 : index
    %3 = vector.load %arg3[%c0_3, %c0_4] : memref<32x1xf32, #tpu.memory_space<vmem>>, vector<32x1xf32>
    %4 = vector.broadcast %3 : vector<32x1xf32> to vector<32x128xf32>
    %5 = arith.addf %2, %4 : vector<32x128xf32>
    %cst_5 = arith.constant 0.000000e+00 : f32
    %6 = vector.broadcast %cst_5 : f32 to vector<32x128xf32>
    %7 = arith.maximumf %5, %6 : vector<32x128xf32>
    %c0_6 = arith.constant 0 : index
    %c0_7 = arith.constant 0 : index
    %8 = vector.load %arg4[%c0_6, %c0_7] : memref<4x32xf32, #tpu.memory_space<vmem>>, vector<4x32xf32>
    %cst_8 = arith.constant dense<0.000000e+00> : vector<4x128xf32>
    %9 = tpu.matmul %8, %7, %cst_8 {dimension_numbers = #tpu.dot_dimension_numbers<[1], [0], [0], [1], [0, 0, 1, 1], [], []>} : vector<4x32xf32>, vector<32x128xf32>, vector<4x128xf32> -> vector<4x128xf32>
    %c0_9 = arith.constant 0 : index
    %c0_10 = arith.constant 0 : index
    %10 = vector.load %arg5[%c0_9, %c0_10] : memref<4x1xf32, #tpu.memory_space<vmem>>, vector<4x1xf32>
    %11 = vector.broadcast %10 : vector<4x1xf32> to vector<4x128xf32>
    %12 = arith.addf %9, %11 : vector<4x128xf32>
    %cst_11 = arith.constant dense<0xFF800000> : vector<128xf32>
    %13 = vector.multi_reduction <maximumf>, %12, %cst_11 [0] : vector<4x128xf32> to vector<128xf32>
    %14 = vector.shape_cast %13 : vector<128xf32> to vector<1x128xf32>
    %15 = vector.broadcast %14 : vector<1x128xf32> to vector<4x128xf32>
    %16 = arith.subf %12, %15 : vector<4x128xf32>
    %17 = math.exp %16 : vector<4x128xf32>
    %cst_12 = arith.constant dense<0.000000e+00> : vector<128xf32>
    %18 = vector.multi_reduction <add>, %17, %cst_12 [0] : vector<4x128xf32> to vector<128xf32>
    %19 = vector.shape_cast %18 : vector<128xf32> to vector<1x128xf32>
    %20 = tpu.reciprocal %19 {approx = true} : vector<1x128xf32> -> vector<1x128xf32>
    %21 = vector.broadcast %20 : vector<1x128xf32> to vector<4x128xf32>
    %22 = arith.mulf %17, %21 : vector<4x128xf32>
    %c0_13 = arith.constant 0 : index
    %c0_14 = arith.constant 0 : index
    %23 = vector.load %arg6[%c0_13, %c0_14] : memref<4x128xf32, #tpu.memory_space<vmem>>, vector<4x128xf32>
    tpu.vector_store %arg6[%c0_13, %c0_14], %22 {strides = array<i32>} : memref<4x128xf32, #tpu.memory_space<vmem>>, vector<4x128xf32>,
    return
  }
  func.func @transform_0(%arg0: i32) -> (i32, i32) {
    %c0_i32 = arith.constant 0 : i32
    %c0_i32_0 = arith.constant 0 : i32
    return %c0_i32, %arg0 : i32, i32
  }
  func.func @transform_1(%arg0: i32) -> (i32, i32) {
    %c0_i32 = arith.constant 0 : i32
    %c0_i32_0 = arith.constant 0 : i32
    %c0_i32_1 = arith.constant 0 : i32
    return %c0_i32, %c0_i32_0 : i32, i32
  }
  func.func @transform_2(%arg0: i32) -> (i32, i32) {
    %c0_i32 = arith.constant 0 : i32
    %c0_i32_0 = arith.constant 0 : i32
    %c0_i32_1 = arith.constant 0 : i32
    return %c0_i32, %c0_i32_0 : i32, i32
  }
  func.func @transform_3(%arg0: i32) -> (i32, i32) {
    %c0_i32 = arith.constant 0 : i32
    %c0_i32_0 = arith.constant 0 : i32
    %c0_i32_1 = arith.constant 0 : i32
    return %c0_i32, %c0_i32_0 : i32, i32
  }
  func.func @transform_4(%arg0: i32) -> (i32, i32) {
    %c0_i32 = arith.constant 0 : i32
    %c0_i32_0 = arith.constant 0 : i32
    %c0_i32_1 = arith.constant 0 : i32
    return %c0_i32, %c0_i32_0 : i32, i32
  }
  func.func @transform_5(%arg0: i32) -> (i32, i32) {
    %c0_i32 = arith.constant 0 : i32
    %c0_i32_0 = arith.constant 0 : i32
    return %c0_i32, %arg0 : i32, i32
  }
}

</mosaic_0001>

<bundles_post_ra>
// kernel: tpu_custom_call.1
= control target key start
LH: loop header
LB: loop body
LE: loop exit
PB: predicated region body
PF: predicated region fallthrough
CT: control target
= control target key end

     0   :  { %vm51_vm0 = vcmask 130048   ;;  %v351_v4 = vmov 0   ;;  %s438_s0 = inlined_call_operand.vmem [shape: f32[16,128], index: 0, kind: input, shape index: {}]   ;;  %s439_s1 = inlined_call_operand.vmem [shape: f32[32,16], index: 1, kind: input, shape index: {}]   ;;  %s440_s2 = inlined_call_operand.vmem [shape: f32[32,1], index: 2, kind: input, shape index: {}]   ;;  %s441_s3 = inlined_call_operand.vmem [shape: f32[4,32], index: 3, kind: input, shape index: {}]   ;;  %s442_s4 = inlined_call_operand.vmem [shape: f32[4,1], index: 4, kind: input, shape index: {}]   ;;  %s443_s5 = inlined_call_operand.hbm [shape: f32[4,128], index: 5, kind: output, shape index: {}]  }
   0x1   :  { %v21_v0 = vld [vmem:[%s438_s0] sm:$0xff]  ;;  %v22_v1 = vld [vmem:[%s438_s0 + $0x8] sm:$0xff]  ;;  %321 = vset.pattern.permute.xlu0 %v351_v4  ;;  %322 = vset.pattern.permute.xlu1 %v351_v4  ;;  %v29_v6 = vld [vmem:[%s440_s2 + $0x10] sm:$0xff] }
   0x2   :  { %v23_v2 = vld [vmem:[%s439_s1] sm:$0xff]  ;;  %v306_v3 = vpack.c.bf16 %v22_v1, %v21_v0 }
   0x3   :  { %289 = vmatprep.mubr.msk.f32.mxu0 %vm51_vm0, %v23_v2  ;;  %v27_v5 = vld [vmem:[%s440_s2] sm:$0xff] }
   0x4   :  { %307 = vmatprep.subr.bf16.mxu0 %v306_v3  ;;  %33 = vperm.xlu0 %321, %v27_v5  }
   0x5   :  { %10 = vsyncpa [#allocation3], 0  ;;  %309 = vmatpush3.bf16.msra.mxu0 %v306_v3  ;;  %v24_v7 = vld [vmem:[%s439_s1 + $0x8] sm:$0xff]  ;;  %43 = vperm.xlu1 %322, %v29_v6   ;;  %v25_v9 = vld [vmem:[%s439_s1 + $0x10] sm:$0xff]  ;;  %v352_v13 = vmov 0.0|0.0   ;;  %vm353_vm1 = vmmov 0  }
   0x6   :  { %v28_v8 = vld [vmem:[%s440_s2 + $0x8] sm:$0xff]  ;;  %v30_v10 = vld [vmem:[%s440_s2 + $0x18] sm:$0xff]  ;;  %v154_v12 = vld [vmem:[%s442_s4] sm:$0xf]  ;;  %310 = vmatprep.subr.bf16.mxu1 %v352_v13  ;;  %v354_v14 = vmov 0.0   ;;  %vm160_vm2 = vcmask 261120  }
   0x7   :  { %v26_v11 = vld [vmem:[%s439_s1 + $0x18] sm:$0xff]  ;;  %303 = vmatprep.mubr.msk.f32.mxu1 %vm353_vm1, %v354_v14  ;;  %v153_v33 = vld [vmem:[%s441_s3] sm:$0xf]  ;;  %vm234_vm3 = vcmask 1043456   ;;  %s355_s3 = smov [#allocation2]  }
   0x8   :  { %290 = vmatmul.mubr.msk.f32.vlgmr.msra.gmra.mrb[0].mxu0 %vm51_vm0, %v24_v7  ;;  %38 = vperm.xlu0 %321, %v28_v8   ;;  %s261_s4 = sshll.u32 %s355_s3, 4  ;;  %s262_s4 = int_to_ptr.vmem [resolvable:$true] %s261_s4 }
   0x9   :  { %292 = vmatprep.mubr.msk.f32.mxu0 %vm51_vm0, %v25_v9  ;;  %48 = vperm.xlu1 %322, %v30_v10   ;;  %s327_s14 = scalar_lea.vmem %s262_s4, 64  ;;  %p332_p1 = scmp.lt.s32.totalorder %s262_s4, %s262_s4 }
   0xa   :  { %p328_p0 = scmp.ne.s32.totalorder %s262_s4, %s327_s14  ;;  %p333_p2 = scmp.lt.s32.totalorder %s327_s14, %s327_s14 }
   0xc   :  { %293 = vmatmul.mubr.msk.f32.gmra.mrb[2].mxu0 %vm51_vm0, %v26_v11  ;;  %157 = vperm.xlu0 %321, %v154_v12   ;;  %p334_p3 = por %p333_p2, %p332_p1 }
   0xe   :  { %p335_p4 = pnand %p334_p3, %p328_p0 }
  0x83   :  { %v34_v15 = vpop.permute.xlu0 %33 }
  0x84   :  { %v44_v16 = vpop.permute.xlu1 %43 }
  0x87   :  { %v39_v17 = vpop.permute.xlu0 %38 }
  0x88   :  { %v49_v23 = vpop.permute.xlu1 %48 }
  0x8b   :  { %v158_v34 = vpop.permute.xlu0 %157 }
  0xdb   :  { %v291_v18 = vpop.f32.mrb[0].mxu0 }
  0xdc   :  { %v136_v19 = vadd.f32 %v291_v18, %v39_v17  ;;  %v130_v20 = vpop.f32.mrb[1].mxu0 }
  0xdd   :  { %v131_v21 = vadd.f32 %v130_v20, %v34_v15 }
  0xde   :  { %v150_v22 = vmax.f32 %v136_v19, 0.0 }
  0xdf   :  { %v149_v24 = vmax.f32 %v131_v21, 0.0  ;;  %v294_v25 = vpop.f32.mrb[2].mxu0 }
  0xe0   :  { %v146_v26 = vadd.f32 %v294_v25, %v49_v23  ;;  %v140_v27 = vpop.f32.mrb[3].mxu0 }
  0xe1   :  { %v141_v28 = vadd.f32 %v140_v27, %v44_v16  ;;  %v311_v29 = vpack.c.bf16 %v150_v22, %v149_v24 }
  0xe2   :  { %v152_v30 = vmax.f32 %v146_v26, 0.0 }
  0xe3   :  { %v151_v31 = vmax.f32 %v141_v28, 0.0  ;;  %312 = vmatpush3.bf16.msra.mxu1 %v311_v29 }
  0xe4   :  { %313 = vmatprep.subr.bf16.mxu1 %v352_v13 }
  0xe5   :  { %v314_v32 = vpack.c.bf16 %v152_v30, %v151_v31 }
  0xe7   :  { %315 = vmatpush3.bf16.msra.mxu1 %v314_v32 }
  0xea   :  { %304 = vmatmul.mubr.msk.f32.vlgmr.msra.gmra.mrb[0].mxu1 %vm160_vm2, %v153_v33 }
 0x1bd   :  { %v230_v35 = vpop.f32.mrb[0].mxu1 }
 0x1be   :  { %v231_v36 = vadd.f32 %v230_v35, %v158_v34  ;;  %v305_v37 = vpop.f32.mrb[1].mxu1 }
 0x1c0   :  { %v235_v38 = vsel %vm234_vm3, %v231_v36, -inf }
 0x1c1   :  { %v236_v39 = vrot.slane %v235_v38, 4 }
 0x1c3   :  { %v237_v40 = vmax.f32 %v235_v38, %v236_v39 }
 0x1c5   :  { %v238_v41 = vrot.slane %v237_v40, 2 }
 0x1c7   :  { %v239_v42 = vmax.f32 %v237_v40, %v238_v41 }
 0x1c9   :  { %v240_v43 = vrot.slane %v239_v42, 1 }
 0x1cb   :  { %v241_v44 = vmax.f32 %v239_v42, %v240_v43 }
 0x1cd   :  { %v242_v45 = vsub.f32 %v231_v36, %v241_v44 }
 0x1cf   :  { %v243_v46 = vmul.f32 1.442695, %v242_v45 }
 0x1d1   :  { %323 = vpow2.f32 %v243_v46 }
 0x1db   :  { %v324_v47 = vpop.eup %323 }
 0x1dc   :  { %v245_v48 = vsel %vm234_vm3, %v324_v47, 0.0 }
 0x1dd   :  { %v246_v49 = vrot.slane %v245_v48, 4 }
 0x1df   :  { %v247_v50 = vadd.f32 %v246_v49, %v245_v48 }
 0x1e1   :  { %v248_v51 = vrot.slane %v247_v50, 2 }
 0x1e3   :  { %v249_v52 = vadd.f32 %v248_v51, %v247_v50 }
 0x1e5   :  { %v250_v53 = vrot.slane %v249_v52, 1 }
 0x1e7   :  { %v251_v54 = vadd.f32 %v250_v53, %v249_v52 }
 0x1e9   :  { %325 = vrcp.f32 %v251_v54 }
 0x1f3   :  { %v326_v55 = vpop.eup %325 }
 0x1f4   :  { %v253_v56 = vmul.f32 %v326_v55, %v324_v47 }
 0x1f6   :  { %254 = vst [vmem:[#allocation2] sm:$0xf] %v253_v56 }
 0x1f7   :  { %338 = shalt.err (!%p335_p4)
}
 0x1f8   :  { %s339_s17 = scalar_lea.hbm %s443_s5, 64 }
 0x1f9   :  { %p340_p5 = scmp.ne.s32.totalorder %s443_s5, %s339_s17  ;;  %p343_p6 = scmp.lt.u32.totalorder %s339_s17, %s443_s5 }
 0x1fb   :  { %p345_p7 = pnand %p343_p6, %p340_p5 }
 0x1fd   :  { %348 = shalt.err (!%p345_p7)
}
 0x1fe   :  { %264 = dma.vmem_to_hbm [thread:$0]  %s262_s4, 64, %s443_s5, [#allocation3]  }
 0x1ff   :  { %349 = dma.done.wait [#allocation3], 64  }
 0x200   :  { %350 = vsyncadd [#allocation3], 4294967232 }
 0x201   :  { %268 = vsyncpa [#allocation3], 1 }

</bundles_post_ra>
